<compile_context>
chip_gen: v5e
topology: v5e:2x2
jax: 0.10.0
libtpu: 0.0.40
codegen_flags: <defaults>
</compile_context>

<pallas_src>
import collections

import numpy as np
import jax
import jax.numpy as jnp
from jax.experimental import pallas as pl
from jax.experimental.pallas import tpu as pltpu


# ----------------------------- small helpers --------------------------------

_MIB = 1024 * 1024


def _cdiv(a, b):
    return -(-a // b)


def _round_up(a, m):
    return _cdiv(a, m) * m


_TpuGen = collections.namedtuple(
    "_TpuGen", ["vmem_budget", "num_cores", "fused_k_limit", "scoped_default"])


def _tpu_generation():
    """Generation-aware VMEM budget / TensorCore count (perf review: ~12 MiB
    budget on v5e (16 MiB scoped default), ~24 MiB on v6e, ~20 MiB on v7x)."""
    kind = ""
    try:
        kind = jax.devices()[0].device_kind.lower()
    except Exception:  # no TPU visible -> conservative defaults
        pass
    if "v7" in kind or "7x" in kind:
        # 2 TensorCores per chip; 64 MiB physical / 32 MiB scoped VMEM per TC.
        return _TpuGen(20 * _MIB, 2, 8 * _MIB, 32 * _MIB)
    if "v6" in kind:
        return _TpuGen(24 * _MIB, 1, 16 * _MIB, 32 * _MIB)
    if "v5" in kind:
        return _TpuGen(12 * _MIB, 1, 16 * _MIB, 16 * _MIB)
    return _TpuGen(12 * _MIB, 1, 12 * _MIB, 16 * _MIB)


_SINGLE_BUFFER_OK = None


def _single_buffer_supported():
    """Probe once whether BlockSpec(pipeline_mode=pl.Buffered(1)) is accepted
    by this JAX/Mosaic version (used to single-buffer grid-invariant weights)."""
    global _SINGLE_BUFFER_OK
    if _SINGLE_BUFFER_OK is None:
        try:
            def probe_kernel(a_ref, w_ref, o_ref):
                o_ref[...] = a_ref[...] + w_ref[...]

            f = pl.pallas_call(
                probe_kernel,
                out_shape=jax.ShapeDtypeStruct((16, 128), jnp.float32),
                grid=(2,),
                in_specs=[
                    pl.BlockSpec((8, 128), lambda i: (i, 0)),
                    pl.BlockSpec((8, 128), lambda i: (0, 0),
                                 pipeline_mode=pl.Buffered(1)),
                ],
                out_specs=pl.BlockSpec((8, 128), lambda i: (i, 0)),
            )
            jax.block_until_ready(
                f(jnp.zeros((16, 128), jnp.float32),
                  jnp.zeros((8, 128), jnp.float32)))
            _SINGLE_BUFFER_OK = True
        except Exception:
            _SINGLE_BUFFER_OK = False
    return _SINGLE_BUFFER_OK


def _resident_spec(shape, single_buffer):
    """BlockSpec for a grid-invariant (VMEM-resident) operand."""
    index_map = lambda i, _nd=len(shape): (0,) * _nd
    if single_buffer:
        # The second pipeline buffer of a constant-index operand is dead VMEM.
        return pl.BlockSpec(shape, index_map, pipeline_mode=pl.Buffered(1))
    return pl.BlockSpec(shape, index_map)


def _pick_epoch_block(epcho, per_epoch_bytes, resident_bytes, gen):
    """Epochs per grid step.

    * v5e/v6e (1 TensorCore): fewest grid steps that fit the VMEM budget -- a
      single step whenever possible (splitting only adds ~0.35us/step).
    * v7x (2 TensorCores): >= 2 steps, an even number of equal-size,
      sublane-aligned (multiple-of-8) blocks so both cores get balanced work.
    """
    if epcho <= 8:
        return epcho
    fit = max(8, (gen.vmem_budget - resident_bytes) // (2 * per_epoch_bytes))
    if gen.num_cores <= 1:
        if epcho <= fit:
            return epcho                      # one grid step
        n_steps = _cdiv(epcho, fit)
    else:
        n_steps = max(2, _cdiv(epcho, fit))
        n_steps += n_steps % 2                # even step count for 2 cores
    return _round_up(_cdiv(epcho, n_steps), 8)


# ------------------------------ fused-K path --------------------------------

def _fused_kernel(x_ref, k_ref, c_ref, o_ref):
    # x_ref: (E, t_1*n)   k_ref: (t_1*n, n*out)   c_ref: (1, n*out)
    # o_ref: (E, n*out)   -- lane-dense loads and stores, single MXU matmul.
    o_ref[...] = (
        jnp.dot(x_ref[...], k_ref[...], preferred_element_type=jnp.float32)
        + c_ref[...]
    )


def _forward_fused(x, params):
    epcho, t_1, n = x.shape
    out_size = params["out_size"]
    k_fused, c_flat = params["k"], params["c"]
    in_cols, out_cols = t_1 * n, n * out_size

    gen = _tpu_generation()
    single_buf = _single_buffer_supported()

    itemsize = k_fused.dtype.itemsize
    resident = k_fused.size * itemsize + c_flat.size * 4
    if not single_buf:
        resident *= 2                         # default double-buffering
    per_epoch = in_cols * itemsize + out_cols * 4
    e_blk = _pick_epoch_block(epcho, per_epoch, resident, gen)

    x2d = x.reshape(epcho, in_cols).astype(k_fused.dtype)
    pad = (-epcho) % e_blk
    if pad:                                   # avoid a ragged tail block
        x2d = jnp.pad(x2d, ((0, pad), (0, 0)))
    epcho_pad = epcho + pad

    grid_spec = pltpu.PrefetchScalarGridSpec(
        num_scalar_prefetch=0,
        grid=(epcho_pad // e_blk,),
        in_specs=[
            pl.BlockSpec((e_blk, in_cols), lambda i: (i, 0)),
            _resident_spec((in_cols, out_cols), single_buf),   # fused weight K
            _resident_spec((1, out_cols), single_buf),         # folded bias C
        ],
        out_specs=pl.BlockSpec((e_blk, out_cols), lambda i: (i, 0)),
    )

    cp = dict(dimension_semantics=("parallel",))
    footprint = 2 * e_blk * per_epoch + resident
    if footprint > gen.scoped_default:        # defensive: raise scoped limit
        cp["vmem_limit_bytes"] = int(footprint + 2 * _MIB)

    out2d = pl.pallas_call(
        _fused_kernel,
        out_shape=jax.ShapeDtypeStruct((epcho_pad, out_cols), jnp.float32),
        grid_spec=grid_spec,
        compiler_params=pltpu.CompilerParams(**cp),
    )(x2d, k_fused, c_flat)

    if pad:
        out2d = out2d[:epcho]
    return out2d.reshape(epcho, n, out_size)


# --------------------------- two-matmul fallback -----------------------------

def _twostage_kernel(x_ref, wlt_ref, bl_ref, wr_ref, br_ref, o_ref):
    # x_ref: (t_1, n)   wlt_ref: (n, n) = W_lin.T   bl_ref: (1, n)
    # wr_ref: (out, t_1)   br_ref: (out, 1)
    # o_ref: (out, n) = z.T layout (lane-dense on n); wrapper swaps axes.
    y = (jnp.dot(x_ref[...], wlt_ref[...], preferred_element_type=jnp.float32)
         + bl_ref[...])
    o_ref[...] = (
        jnp.dot(wr_ref[...], y.astype(wr_ref.dtype),
                preferred_element_type=jnp.float32)
        + br_ref[...]
    )


def _forward_twostage(x, params):
    epcho, t_1, n = x.shape
    out_size = params["out_size"]
    wl_t, bl, wr, br = params["wl_t"], params["bl"], params["wr"], params["br"]

    gen = _tpu_generation()
    single_buf = _single_buffer_supported()

    itemsize = wl_t.dtype.itemsize
    resident = (wl_t.size + wr.size) * itemsize + (bl.size + br.size) * 4
    if not single_buf:
        resident *= 2
    per_epoch = t_1 * n * itemsize + out_size * n * 4

    x3 = x.astype(wl_t.dtype)

    # One epoch per grid step: in the large-n regime where this path is used
    # the per-step compute (>= t_1*n^2 MACs) dwarfs the ~0.35us step overhead.
    grid_spec = pltpu.PrefetchScalarGridSpec(
        num_scalar_prefetch=0,
        grid=(epcho,),
        in_specs=[
            pl.BlockSpec((None, t_1, n), lambda i: (i, 0, 0)),
            _resident_spec((n, n), single_buf),          # W_lin.T (resident)
            _resident_spec((1, n), single_buf),          # b_lin
            _resident_spec((out_size, t_1), single_buf),  # W_reg
            _resident_spec((out_size, 1), single_buf),   # b_reg
        ],
        out_specs=pl.BlockSpec((None, out_size, n), lambda i: (i, 0, 0)),
    )

    cp = dict(dimension_semantics=("parallel",))
    footprint = 2 * per_epoch + resident
    if footprint > gen.scoped_default:
        cp["vmem_limit_bytes"] = int(footprint + 2 * _MIB)

    # TODO(synk): for extremely large n (W_lin no longer VMEM-resident) this
    # path would additionally need tiling over n; not required at the sizes
    # where the fused-K path is gated off.
    zt = pl.pallas_call(
        _twostage_kernel,
        out_shape=jax.ShapeDtypeStruct((epcho, out_size, n), jnp.float32),
        grid_spec=grid_spec,
        compiler_params=pltpu.CompilerParams(**cp),
    )(x3, wl_t, bl, wr, br)

    # z.T layout kept lane-dense until here; hand back (epcho, n, out).
    return jnp.swapaxes(zt, 1, 2)


# ----------------------------- public wrapper --------------------------------

def prepare_mlinreg_params(w_lin, b_lin, w_reg, b_reg, *,
                           compute_dtype=jnp.float32,
                           fused_k_limit_bytes=None):
    """One-time parameter preparation (hoisted out of the per-call forward).

    "fused":    single matmul against K[(t*n+k),(j*out+o)] = W_lin[j,k]*W_reg[o,t]
                with C[j,o] = b_lin[j]*sum_t W_reg[o,t] + b_reg[o] folded in.
    "twostage": z.T = W_reg @ (x @ W_lin.T + b_lin) + b_reg, chosen when the
                fused weight (t_1*n^2*out elements, ~n*out/(n+out)x MAC blowup)
                would exceed the generation-aware size limit.

    compute_dtype: set to jnp.bfloat16 for MXU-bound (large n / epcho) problems
    on v6e/v7x; biases and accumulation stay f32.
    """
    n = w_lin.shape[0]
    out_size, t_1 = w_reg.shape
    assert w_lin.shape == (n, n)
    assert b_lin.shape == (n,)
    assert b_reg.shape == (out_size,)

    if fused_k_limit_bytes is None:
        fused_k_limit_bytes = _tpu_generation().fused_k_limit

    itemsize = np.dtype(compute_dtype).itemsize
    k_bytes = itemsize * t_1 * n * n * out_size

    if k_bytes <= fused_k_limit_bytes:
        k_fused = (jnp.einsum("jk,ot->tkjo", w_lin, w_reg)
                   .reshape(t_1 * n, n * out_size).astype(compute_dtype))
        c_flat = (b_lin[:, None] * jnp.sum(w_reg, axis=1)[None, :]
                  + b_reg[None, :]).reshape(1, n * out_size).astype(jnp.float32)
        return {"mode": "fused", "t_1": t_1, "n": n, "out_size": out_size,
                "k": k_fused, "c": c_flat}

    return {"mode": "twostage", "t_1": t_1, "n": n, "out_size": out_size,
            "wl_t": jnp.asarray(w_lin.T, dtype=compute_dtype),
            "bl": b_lin.reshape(1, n).astype(jnp.float32),
            "wr": jnp.asarray(w_reg, dtype=compute_dtype),
            "br": b_reg.reshape(out_size, 1).astype(jnp.float32)}


def mlinreg_forward(x, params):
    """x: (epcho, t_1, n) -> (epcho, n, outputSize) f32."""
    epcho, t_1, n = x.shape
    assert t_1 == params["t_1"] and n == params["n"]
    if params["mode"] == "fused":
        return _forward_fused(x, params)
    return _forward_twostage(x, params)


def mlinreg_reference(x, w_lin, b_lin, w_reg, b_reg):
    y = jnp.einsum("etn,jn->etj", x, w_lin) + b_lin          # (epcho, t_1, n)
    yt = jnp.swapaxes(y, 1, 2)                               # (epcho, n, t_1)
    return jnp.einsum("ent,ot->eno", yt, w_reg) + b_reg      # (epcho, n, out)


if __name__ == "__main__":
    # Module hyperparameters: dim_batch == t_1, inputSize == n, outputSize,
    # dim_hidden (unused in forward).
    epcho, dim_batch, input_size, output_size, dim_hidden = 64, 8, 32, 16, 32

    key = jax.random.PRNGKey(0)
    k_x, k_wl, k_bl, k_wr, k_br = jax.random.split(key, 5)

    x = jax.random.normal(k_x, (epcho, dim_batch, input_size), dtype=jnp.float32)

    # Deterministic parameter init (uniform, roughly matching nn.Linear scale).
    bound_l = 1.0 / jnp.sqrt(input_size)
    w_lin = jax.random.uniform(k_wl, (input_size, input_size), jnp.float32,
                               -bound_l, bound_l)
    b_lin = jax.random.uniform(k_bl, (input_size,), jnp.float32, -bound_l, bound_l)

    bound_r = 1.0 / jnp.sqrt(dim_batch)
    w_reg = jax.random.uniform(k_wr, (output_size, dim_batch), jnp.float32,
                               -bound_r, bound_r)
    b_reg = jax.random.uniform(k_br, (output_size,), jnp.float32, -bound_r, bound_r)

    # TODO(synk): hidden_regressor (Linear(outputSize, inputSize)) is dead code
    # in the module's forward pass, so its parameters are not materialized here.

    ref = mlinreg_reference(x, w_lin, b_lin, w_reg, b_reg)

    # Primary (fused-K) path -- what small shapes like these use.
    params = prepare_mlinreg_params(w_lin, b_lin, w_reg, b_reg)
    out = jax.block_until_ready(mlinreg_forward(x, params))
    assert out.shape == (epcho, input_size, output_size)
    assert jnp.allclose(out, ref, atol=1e-4, rtol=1e-4)

    # Also exercise the two-stage fallback path (taken automatically when the
    # fused weight would exceed the generation-aware size limit).
    params_fb = prepare_mlinreg_params(w_lin, b_lin, w_reg, b_reg,
                                       fused_k_limit_bytes=0)
    out_fb = jax.block_until_ready(mlinreg_forward(x, params_fb))
    assert out_fb.shape == (epcho, input_size, output_size)
    assert jnp.allclose(out_fb, ref, atol=1e-4, rtol=1e-4)

    print("KERNEL_OK")
</pallas_src>

<mosaic_0001>
module attributes {stable_mosaic.version = 11 : i64} {
  func.func @probe_kernel(%arg0: i32, %arg1: memref<8x128xf32, #tpu.memory_space<vmem>>, %arg2: memref<8x128xf32, #tpu.memory_space<vmem>>, %arg3: memref<8x128xf32, #tpu.memory_space<vmem>>) attributes {dimension_semantics = [#tpu.dimension_semantics<arbitrary>], iteration_bounds = array<i64: 2>, scalar_prefetch = 0 : i64, scratch_operands = 0 : i64, tpu.core_type = #tpu.core_type<tc>, window_params = [{transform_indices = @transform_0, window_bounds = array<i64: 8, 128>}, {pipeline_mode = #tpu.pipeline_mode<synchronous>, transform_indices = @transform_1, window_bounds = array<i64: 8, 128>}, {transform_indices = @transform_2, window_bounds = array<i64: 8, 128>}]} {
    %c0 = arith.constant 0 : index
    %c0_0 = arith.constant 0 : index
    %0 = vector.load %arg1[%c0, %c0_0] : memref<8x128xf32, #tpu.memory_space<vmem>>, vector<8x128xf32>
    %c0_1 = arith.constant 0 : index
    %c0_2 = arith.constant 0 : index
    %1 = vector.load %arg2[%c0_1, %c0_2] : memref<8x128xf32, #tpu.memory_space<vmem>>, vector<8x128xf32>
    %2 = arith.addf %0, %1 : vector<8x128xf32>
    %c0_3 = arith.constant 0 : index
    %c0_4 = arith.constant 0 : index
    %3 = vector.load %arg3[%c0_3, %c0_4] : memref<8x128xf32, #tpu.memory_space<vmem>>, vector<8x128xf32>
    tpu.vector_store %arg3[%c0_3, %c0_4], %2 {strides = array<i32>} : memref<8x128xf32, #tpu.memory_space<vmem>>, vector<8x128xf32>,
    return
  }
  func.func @transform_0(%arg0: i32) -> (i32, i32) {
    %c0_i32 = arith.constant 0 : i32
    %c0_i32_0 = arith.constant 0 : i32
    return %arg0, %c0_i32 : i32, i32
  }
  func.func @transform_1(%arg0: i32) -> (i32, i32) {
    %c0_i32 = arith.constant 0 : i32
    %c0_i32_0 = arith.constant 0 : i32
    %c0_i32_1 = arith.constant 0 : i32
    return %c0_i32, %c0_i32_0 : i32, i32
  }
  func.func @transform_2(%arg0: i32) -> (i32, i32) {
    %c0_i32 = arith.constant 0 : i32
    %c0_i32_0 = arith.constant 0 : i32
    return %arg0, %c0_i32 : i32, i32
  }
}

module attributes {stable_mosaic.version = 11 : i64} {
  func.func @_fused_kernel(%arg0: i32, %arg1: memref<64x256xf32, #tpu.memory_space<vmem>>, %arg2: memref<256x512xf32, #tpu.memory_space<vmem>>, %arg3: memref<1x512xf32, #tpu.memory_space<vmem>>, %arg4: memref<64x512xf32, #tpu.memory_space<vmem>>) attributes {dimension_semantics = [#tpu.dimension_semantics<parallel>], iteration_bounds = array<i64: 1>, scalar_prefetch = 0 : i64, scratch_operands = 0 : i64, tpu.core_type = #tpu.core_type<tc>, window_params = [{transform_indices = @transform_0, window_bounds = array<i64: 64, 256>}, {pipeline_mode = #tpu.pipeline_mode<synchronous>, transform_indices = @transform_1, window_bounds = array<i64: 256, 512>}, {pipeline_mode = #tpu.pipeline_mode<synchronous>, transform_indices = @transform_2, window_bounds = array<i64: 1, 512>}, {transform_indices = @transform_3, window_bounds = array<i64: 64, 512>}]} {
    %c0 = arith.constant 0 : index
    %c0_0 = arith.constant 0 : index
    %0 = vector.load %arg1[%c0, %c0_0] : memref<64x256xf32, #tpu.memory_space<vmem>>, vector<64x256xf32>
    %c0_1 = arith.constant 0 : index
    %c0_2 = arith.constant 0 : index
    %1 = vector.load %arg2[%c0_1, %c0_2] : memref<256x512xf32, #tpu.memory_space<vmem>>, vector<256x512xf32>
    %cst = arith.constant dense<0.000000e+00> : vector<64x512xf32>
    %2 = tpu.matmul %0, %1, %cst {dimension_numbers = #tpu.dot_dimension_numbers<[1], [0], [0], [1], [0, 0, 1, 1], [], []>} : vector<64x256xf32>, vector<256x512xf32>, vector<64x512xf32> -> vector<64x512xf32>
    %c0_3 = arith.constant 0 : index
    %c0_4 = arith.constant 0 : index
    %3 = vector.load %arg3[%c0_3, %c0_4] : memref<1x512xf32, #tpu.memory_space<vmem>>, vector<1x512xf32>
    %4 = vector.broadcast %3 : vector<1x512xf32> to vector<64x512xf32>
    %5 = arith.addf %2, %4 : vector<64x512xf32>
    %c0_5 = arith.constant 0 : index
    %c0_6 = arith.constant 0 : index
    %6 = vector.load %arg4[%c0_5, %c0_6] : memref<64x512xf32, #tpu.memory_space<vmem>>, vector<64x512xf32>
    tpu.vector_store %arg4[%c0_5, %c0_6], %5 {strides = array<i32>} : memref<64x512xf32, #tpu.memory_space<vmem>>, vector<64x512xf32>,
    return
  }
  func.func @transform_0(%arg0: i32) -> (i32, i32) {
    %c0_i32 = arith.constant 0 : i32
    %c0_i32_0 = arith.constant 0 : i32
    return %arg0, %c0_i32 : i32, i32
  }
  func.func @transform_1(%arg0: i32) -> (i32, i32) {
    %c0_i32 = arith.constant 0 : i32
    %c0_i32_0 = arith.constant 0 : i32
    %c0_i32_1 = arith.constant 0 : i32
    return %c0_i32, %c0_i32_0 : i32, i32
  }
  func.func @transform_2(%arg0: i32) -> (i32, i32) {
    %c0_i32 = arith.constant 0 : i32
    %c0_i32_0 = arith.constant 0 : i32
    %c0_i32_1 = arith.constant 0 : i32
    return %c0_i32, %c0_i32_0 : i32, i32
  }
  func.func @transform_3(%arg0: i32) -> (i32, i32) {
    %c0_i32 = arith.constant 0 : i32
    %c0_i32_0 = arith.constant 0 : i32
    return %arg0, %c0_i32 : i32, i32
  }
}

</mosaic_0001>

<bundles_post_ra>
// kernel: tpu_custom_call.1
= control target key start
LH: loop header
LB: loop body
LE: loop exit
PB: predicated region body
PF: predicated region fallthrough
CT: control target
= control target key end

     0   :  { %7 = vsyncpa [#allocation3], 0  ;;  %s633_s0 = inlined_call_operand.hbm [shape: f32[16,128], index: 0, kind: input, shape index: {}]   ;;  %s634_s1 = inlined_call_operand.hbm [shape: f32[8,128], index: 1, kind: input, shape index: {}]   ;;  %s635_s2 = inlined_call_operand.hbm [shape: f32[16,128], index: 2, kind: output, shape index: {}]  }
   0x1   :  { %9 = vsyncpa [#allocation3 + $0x1], 0 }
   0x2   :  { %10 = vsyncpa [#allocation6], 0 }
   0x3   :  { %11 = vsyncpa [#allocation4], 0 }
   0x4   :  { %13 = vsyncpa [#allocation4 + $0x1], 0  ;;  %s495_s9 = smov 0   ;;  %s497_s10 = smov 0  }
   0x5   :  { %s499_s11 = smov 0   ;;  %s501_s12 = smov 0  }
   0x6 LB: > { %s516_s13 = sadd.s32 4294967295, %s477_s12   ;;  %s276_s14 = sadd.s32 4294967294, %s477_s12   ;;  %s477_s12 = sphi %s501_s12, %s645_s12   ;;  %s473_s11 = sphi %s499_s11, %s644_s11   ;;  %s469_s10 = sphi %s497_s10, %s643_s10   ;;  %s465_s9 = sphi %s495_s9, %s642_s9  }
   0x7   : > { %p39_p0 = scmp.ne.s32.totalorder %s469_s10, %s465_s9  ;;  %p40_p1 = scmp.eq.s32.totalorder %s516_s13, 0 }
   0x8   : > { %p84_p2 = scmp.eq.s32.totalorder %s516_s13, 1  ;;  %p90_p3 = scmp.eq.s32.totalorder %s276_s14, 1 }
   0x9   : > { %p525_p4 = por %p40_p1, %p39_p0  ;;  %p277_p5 = scmp.ge.s32.totalorder %s477_s12, 1 }
   0xa   : > { %p530_p6 = por %p90_p3, %p39_p0  ;;  %p97_p7 = scmp.lt.s32.totalorder %s477_s12, 3 }
   0xb   : > { %s109_s19 = sshll.u32 %s634_s1, 4  ;;  %s479_s21 = smov [#allocation5]   ;;  %s110_s19 = int_to_ptr.hbm [resolvable:$true] %s109_s19 }
   0xc   : > { %p538_p8 = pnand %p277_p5, %p97_p7  ;;  %s111_s22 = sshll.u32 %s479_s21, 4  ;;  %s112_s22 = int_to_ptr.vmem [resolvable:$true] %s111_s22 }
   0xd   : > { %s548_s23 = sadd.s32 1, %s477_s12   ;;  %s26_s24 = sadd.s32 1, %s473_s11 }
   0xe   : > { %p298_p10 = pneg %p538_p8  ;;  %s23_s25 = ssub.s32 %s477_s12, %s548_s23 }
   0xf   : > { %p24_p12 = scmp.eq.s32.totalorder %s23_s25, 0  ;;  %p33_p13 = scmp.ne.s32.totalorder %s473_s11, %s469_s10 }
  0x10   : > { %p299_p11 = pnand %p298_p10, %p40_p1  ;;  %p34_p0 = scmp.eq.s32.totalorder %s477_s12, 0 }
  0x11   : > { %s557_s26 = scalar_select %p24_p12, %s473_s11, %s26_s24  }
  0x12   : > { %301 = dma.hbm_to_vmem [thread:$0]  (!%p299_p11), %s110_s19, 128, %s112_s22, [#allocation6]  }
  0x13   : > { %p561_p3 = por %p84_p2, %p33_p13  ;;  %p311_p5 = scmp.lt.s32.totalorder %s477_s12, 2 }
  0x14   : > { %s122_s28 = sand.u32 1, %s473_s11   ;;  %s281_s29 = sshll.u32 %s477_s12, 3 }
  0x15   : > { %p35_p7 = por %p34_p0, %p33_p13  ;;  %s280_s30 = sshll.u32 %s122_s28, 3 }
  0x16   : > { %s130_s5 = scalar_lea.hbm %s633_s0, %s281_s29  ;;  %s126_s7 = scalar_lea.vmem [#allocation2], %s280_s30 }
  0x17   : > { %s132_s6 = sshll.u32 %s130_s5, 4  ;;  %s134_s8 = sshll.u32 %s126_s7, 4  ;;  %s133_s6 = int_to_ptr.hbm [resolvable:$true] %s132_s6  ;;  %s135_s8 = int_to_ptr.vmem [resolvable:$true] %s134_s8 }
  0x18   : > { %p571_p10 = pnand %p311_p5, %p35_p7  ;;  %s123_s17 = scalar_lea.sflag [#allocation3], %s122_s28 }
  0x19   : > { %s377_s18 = sshra.s32 %s133_s6, 4  ;;  %s384_s24 = scalar_lea.hbm %s633_s0, 16  ;;  %s378_s18 = int_to_ptr.hbm [resolvable:$true] %s377_s18 }
  0x1a   : > { %s379_s19 = scalar_lea.hbm %s378_s18, 8  ;;  %p381_p11 = pneg %p571_p10 }
  0x1b   : > { %p380_p2 = scmp.ne.s32.totalorder %s378_s18, %s379_s19  ;;  %p385_p0 = scmp.lt.s32.totalorder %s378_s18, %s633_s0 }
  0x1c   : > { %p386_p5 = scmp.lt.s32.totalorder %s384_s24, %s379_s19 }
  0x1d   : > { %p382_p12 = pnand %p381_p11, %p380_p2 }
  0x1e   : > { %p387_p7 = por %p386_p5, %p385_p0 }
  0x1f   : > { %p383_p13 = pneg %p382_p12 }
  0x21   : > { %p388_p9 = pnand %p387_p7, %p383_p13 }
  0x23   : > { %391 = shalt.err (!%p388_p9)
}
  0x24   : > { %305 = dma.hbm_to_vmem [thread:$0]  (!%p571_p10), %s133_s6, 128, %s135_s8, %s123_s17  }
  0x25   : > { %143 = sbr.rel (%p538_p8) target bundleno = 60 (0x3c), region = 28  ;;  %s588_s28 = sand.u32 (!%p538_p8), 1, %s469_s10  }
  0x26   : > { %s283_s30 = sshll.u32 (!%p538_p8), %s588_s28, 3  ;;  %s146_s3 = scalar_lea.sflag (!%p538_p8), [#allocation3], %s588_s28 }
  0x27   : > { %s149_s4 = scalar_lea.vmem (!%p538_p8), [#allocation2], %s283_s30 }
  0x2a   : > { %452 = dma.done.wait (%p525_p4), %s146_s3, 128  }
  0x2b   : > { %454 = vsyncadd (%p525_p4), %s146_s3, 4294967168 }
  0x2c   : > { %456 = dma.done.wait (%p40_p1), [#allocation6], 128  }
  0x2d   : > { %458 = vsyncadd (%p40_p1), [#allocation6], 4294967168  ;;  %s287_s20 = sshll.u32 %s516_s13, 3  ;;  %s175_s8 = scalar_lea.vmem [#allocation7], %s283_s30  ;;  %v176_v0 = vld [vmem:[%s149_s4] sm:$0xff]  ;;  %v177_v1 = vld [vmem:[#allocation5] sm:$0xff] }
  0x2e   : > { %s191_s7 = scalar_lea.hbm %s635_s2, %s287_s20  ;;  %s193_s14 = sshll.u32 %s175_s8, 4  ;;  %v178_v2 = vadd.f32 %v177_v1, %v176_v0  ;;  %s194_s14 = int_to_ptr.vmem [resolvable:$true] %s193_s14 }
  0x2f   : > { %s195_s17 = sshll.u32 %s191_s7, 4  ;;  %s181_s15 = scalar_lea.sflag [#allocation4], %s588_s28  ;;  %s196_s17 = int_to_ptr.hbm [resolvable:$true] %s195_s17 }
  0x30   : > { %179 = vst [vmem:[%s175_s8] sm:$0xff] %v178_v2  ;;  %s421_s18 = sshra.s32 %s196_s17, 4  ;;  %s427_s22 = scalar_lea.hbm %s635_s2, 16  ;;  %s422_s18 = int_to_ptr.hbm [resolvable:$true] %s421_s18 }
  0x31   : > { %s423_s19 = scalar_lea.hbm %s422_s18, 8  ;;  %p428_p9 = scmp.lt.s32.totalorder %s422_s18, %s635_s2 }
  0x32   : > { %p424_p1 = scmp.ne.s32.totalorder %s422_s18, %s423_s19  ;;  %p429_p10 = scmp.lt.s32.totalorder %s427_s22, %s423_s19 }
  0x34   : > { %p425_p4 = pnand %p424_p1, %p561_p3  ;;  %p430_p2 = por %p429_p10, %p428_p9 }
  0x36   : > { %p426_p8 = pneg %p425_p4 }
  0x38   : > { %p431_p11 = pnand %p430_p2, %p426_p8 }
  0x3a   : > { %434 = shalt.err (!%p431_p11)
}
  0x3b   : > { %296 = dma.vmem_to_hbm [thread:$0]  (%p561_p3), %s194_s14, 128, %s196_s17, %s181_s15  }
  0x3c PF: > { %s207_s29 = sand.u32 1, %s465_s9   ;;  %p641_p12 = scmp.ge.s32.totalorder %s477_s12, 2 }
  0x3d   : > { %s208_s28 = scalar_lea.sflag [#allocation4], %s207_s29 }
  0x3e   : > { %p307_p13 = pnand %p641_p12, %p530_p6 }
  0x40   : > { %p308_p0 = pneg %p307_p13 }
  0x42   : > { %460 = dma.done.wait (%p308_p0), %s208_s28, 128  }
  0x43   : > { %462 = vsyncadd (%p308_p0), %s208_s28, 4294967168  ;;  %p16_p5 = scmp.ge.s32.totalorder %s548_s23, 4   ;;  %s642_s9 = smov %s469_s10 }
  0x44   : > { %s643_s10 = smov %s473_s11  ;;  %s644_s11 = smov %s557_s26 }
  0x45   : > { %s645_s12 = smov %s548_s23  ;;  %18 = sbr.rel (!%p16_p5) target bundleno = 6 (0x6), region = 77 }
  0x4a   :  { %214 = vsyncpa [#allocation3], 1 }
  0x4b   :  { %216 = vsyncpa [#allocation3 + $0x1], 1 }
  0x4c   :  { %217 = vsyncpa [#allocation6], 1 }
  0x4d   :  { %218 = vsyncpa [#allocation4], 1 }
  0x4e   :  { %220 = vsyncpa [#allocation4 + $0x1], 1 }

// kernel: tpu_custom_call.1
= control target key start
LH: loop header
LB: loop body
LE: loop exit
PB: predicated region body
PF: predicated region fallthrough
CT: control target
= control target key end

     0   :  { %8 = vsyncpa [#allocation3], 0  ;;  %s856_s0 = inlined_call_operand.hbm [shape: f32[64,256], index: 0, kind: input, shape index: {}]   ;;  %s857_s1 = inlined_call_operand.hbm [shape: f32[256,512], index: 1, kind: input, shape index: {}]   ;;  %s858_s2 = inlined_call_operand.hbm [shape: f32[1,512], index: 2, kind: input, shape index: {}]   ;;  %s859_s3 = inlined_call_operand.hbm [shape: f32[64,512], index: 3, kind: output, shape index: {}]  }
   0x1   :  { %9 = vsyncpa [#allocation6], 0  ;;  %s28_s14 = sshll.u32 %s857_s1, 4  ;;  %s29_s14 = int_to_ptr.hbm [resolvable:$true] %s28_s14 }
   0x2   :  { %10 = vsyncpa [#allocation4], 0  ;;  %s704_s15 = smov [#allocation5]   ;;  %s15_s19 = sshll.u32 %s856_s0, 4  ;;  %s16_s19 = int_to_ptr.hbm [resolvable:$true] %s15_s19 }
   0x3   :  { %s30_s16 = sshll.u32 %s704_s15, 4  ;;  %s705_s20 = smov 512   ;;  %s31_s16 = int_to_ptr.vmem [resolvable:$true] %s30_s16 }
   0x4   :  { %s706_s21 = smov 32   ;;  %s707_s22 = smov [#allocation2]  }
   0x5   :  { %36 = dma.hbm_to_vmem [thread:$0]  %s29_s14, 16384, %s31_s16, [#allocation6], %s705_s20, %s705_s20, %s706_s21  }
   0x6   :  { %s17_s23 = sshll.u32 %s707_s22, 4  ;;  %s708_s1 = smov 256   ;;  %s18_s23 = int_to_ptr.vmem [resolvable:$true] %s17_s23 }
   0x7   :  { %s709_s24 = smov 16   ;;  %s42_s27 = sshll.u32 %s858_s2, 4  ;;  %s43_s27 = int_to_ptr.hbm [resolvable:$true] %s42_s27 }
   0x8   :  { %23 = dma.hbm_to_vmem [thread:$0]  %s16_s19, 2048, %s18_s23, [#allocation3], %s708_s1, %s708_s1, %s709_s24  }
   0x9   :  { %s710_s28 = smov [#allocation7]  }
   0xa   :  { %s44_s0 = sshll.u32 %s710_s28, 4  ;;  %s45_s0 = int_to_ptr.vmem [resolvable:$true] %s44_s0 }
   0xb   :  { %47 = dma.hbm_to_vmem [thread:$0]  %s43_s27, 64, %s45_s0, [#allocation6]  }
   0xc   :  { %698 = dma.done.wait [#allocation3], 2048  }
   0xd   :  { %699 = vsyncadd [#allocation3], 4294965248 }
   0xe   :  { %700 = dma.done.wait [#allocation6], 16448  }
   0xf   :  { %701 = vsyncadd [#allocation6], 4294950848  ;;  %v137_v0 = vld [vmem:[#allocation5 + $0x1e8] sm:$0xff]  ;;  %v136_v4 = vld [vmem:[#allocation5 + $0x1e0] sm:$0xff]  ;;  %s711_s2 = smov [#allocation8]   ;;  %s580_s5 = sshll.u32 %s859_s3, 4  ;;  %s581_s5 = int_to_ptr.hbm [resolvable:$true] %s580_s5 }
  0x10   :  { %v133_v1 = vld [vmem:[#allocation5 + $0x1c8] sm:$0xff]  ;;  %296 = vmatpush.msra.mxu2 %v137_v0  ;;  %214 = vmatpush.msra.mxu0 %v136_v4  ;;  %v132_v7 = vld [vmem:[#allocation5 + $0x1c0] sm:$0xff]  ;;  %v139_v63 = vld [vmem:[#allocation5 + $0x1f8] sm:$0xff]  ;;  %s578_s29 = sshll.u32 %s711_s2, 4  ;;  %s579_s29 = int_to_ptr.vmem [resolvable:$true] %s578_s29 }
  0x11   :  { %v201_v2 = vld [vmem:[#allocation5 + $0x3e8] sm:$0xff]  ;;  %v200_v9 = vld [vmem:[#allocation5 + $0x3e0] sm:$0xff]  ;;  %v203_v0 = vld [vmem:[#allocation5 + $0x3f8] sm:$0xff] }
  0x12   :  { %337 = vmatpush.msra.mxu3 %v201_v2  ;;  %v197_v3 = vld [vmem:[#allocation5 + $0x3c8] sm:$0xff]  ;;  %297 = vmatpush.msra.mxu2 %v133_v1  ;;  %v128_v11 = vld [vmem:[#allocation5 + $0x1a0] sm:$0xff]  ;;  %v138_v4 = vld [vmem:[#allocation5 + $0x1f0] sm:$0xff] }
  0x13   :  { %v129_v5 = vld [vmem:[#allocation5 + $0x1a8] sm:$0xff]  ;;  %215 = vmatpush.msra.mxu0 %v132_v7  ;;  %255 = vmatpush.msra.mxu1 %v200_v9  ;;  %v196_v12 = vld [vmem:[#allocation5 + $0x3c0] sm:$0xff]  ;;  %v131_v7 = vld [vmem:[#allocation5 + $0x1b8] sm:$0xff] }
  0x14   :  { %v193_v6 = vld [vmem:[#allocation5 + $0x3a8] sm:$0xff]  ;;  %338 = vmatpush.msra.mxu3 %v197_v3  ;;  %298 = vmatpush.msra.mxu2 %v129_v5  ;;  %v124_v13 = vld [vmem:[#allocation5 + $0x180] sm:$0xff]  ;;  %v135_v3 = vld [vmem:[#allocation5 + $0x1d8] sm:$0xff] }
  0x15   :  { %v125_v8 = vld [vmem:[#allocation5 + $0x188] sm:$0xff]  ;;  %v192_v14 = vld [vmem:[#allocation5 + $0x3a0] sm:$0xff]  ;;  %216 = vmatpush.msra.mxu0 %v128_v11  ;;  %256 = vmatpush.msra.mxu1 %v196_v12  ;;  %v199_v5 = vld [vmem:[#allocation5 + $0x3d8] sm:$0xff] }
  0x16   :  { %v189_v10 = vld [vmem:[#allocation5 + $0x388] sm:$0xff]  ;;  %339 = vmatpush.msra.mxu3 %v193_v6  ;;  %299 = vmatpush.msra.mxu2 %v125_v8  ;;  %v120_v17 = vld [vmem:[#allocation5 + $0x160] sm:$0xff]  ;;  %v134_v8 = vld [vmem:[#allocation5 + $0x1d0] sm:$0xff] }
  0x17   :  { %v121_v15 = vld [vmem:[#allocation5 + $0x168] sm:$0xff]  ;;  %v188_v18 = vld [vmem:[#allocation5 + $0x380] sm:$0xff]  ;;  %217 = vmatpush.msra.mxu0 %v124_v13  ;;  %257 = vmatpush.msra.mxu1 %v192_v14  ;;  %v202_v9 = vld [vmem:[#allocation5 + $0x3f0] sm:$0xff] }
  0x18   :  { %v185_v16 = vld [vmem:[#allocation5 + $0x368] sm:$0xff]  ;;  %340 = vmatpush.msra.mxu3 %v189_v10  ;;  %300 = vmatpush.msra.mxu2 %v121_v15  ;;  %v116_v21 = vld [vmem:[#allocation5 + $0x140] sm:$0xff]  ;;  %v195_v10 = vld [vmem:[#allocation5 + $0x3b8] sm:$0xff] }
  0x19   :  { %v117_v19 = vld [vmem:[#allocation5 + $0x148] sm:$0xff]  ;;  %v184_v22 = vld [vmem:[#allocation5 + $0x360] sm:$0xff]  ;;  %218 = vmatpush.msra.mxu0 %v120_v17  ;;  %258 = vmatpush.msra.mxu1 %v188_v18  ;;  %v751_v11 = vld [vmem:[#allocation2 + $0x10] sm:$0xff] }
  0x1a   :  { %v181_v20 = vld [vmem:[#allocation5 + $0x348] sm:$0xff]  ;;  %341 = vmatpush.msra.mxu3 %v185_v16  ;;  %301 = vmatpush.msra.mxu2 %v117_v19  ;;  %v112_v25 = vld [vmem:[#allocation5 + $0x120] sm:$0xff]  ;;  %v753_v12 = vld [vmem:[#allocation2 + $0x18] sm:$0xff] }
  0x1b   :  { %v113_v23 = vld [vmem:[#allocation5 + $0x128] sm:$0xff]  ;;  %v180_v26 = vld [vmem:[#allocation5 + $0x340] sm:$0xff]  ;;  %219 = vmatpush.msra.mxu0 %v116_v21  ;;  %259 = vmatpush.msra.mxu1 %v184_v22  ;;  %v198_v13 = vld [vmem:[#allocation5 + $0x3d0] sm:$0xff] }
  0x1c   :  { %v177_v24 = vld [vmem:[#allocation5 + $0x328] sm:$0xff]  ;;  %342 = vmatpush.msra.mxu3 %v181_v20  ;;  %302 = vmatpush.msra.mxu2 %v113_v23  ;;  %v108_v29 = vld [vmem:[#allocation5 + $0x100] sm:$0xff]  ;;  %v127_v14 = vld [vmem:[#allocation5 + $0x198] sm:$0xff] }
  0x1d   :  { %v109_v27 = vld [vmem:[#allocation5 + $0x108] sm:$0xff]  ;;  %v176_v30 = vld [vmem:[#allocation5 + $0x320] sm:$0xff]  ;;  %220 = vmatpush.msra.mxu0 %v112_v25  ;;  %260 = vmatpush.msra.mxu1 %v180_v26  ;;  %v130_v15 = vld [vmem:[#allocation5 + $0x1b0] sm:$0xff] }
  0x1e   :  { %v173_v28 = vld [vmem:[#allocation5 + $0x308] sm:$0xff]  ;;  %343 = vmatpush.msra.mxu3 %v177_v24  ;;  %303 = vmatpush.msra.mxu2 %v109_v27  ;;  %v104_v33 = vld [vmem:[#allocation5 + $0xe0] sm:$0xff]  ;;  %v191_v16 = vld [vmem:[#allocation5 + $0x398] sm:$0xff] }
  0x1f   :  { %v105_v31 = vld [vmem:[#allocation5 + $0xe8] sm:$0xff]  ;;  %v172_v34 = vld [vmem:[#allocation5 + $0x300] sm:$0xff]  ;;  %221 = vmatpush.msra.mxu0 %v108_v29  ;;  %261 = vmatpush.msra.mxu1 %v176_v30  ;;  %v194_v17 = vld [vmem:[#allocation5 + $0x3b0] sm:$0xff] }
  0x20   :  { %v169_v32 = vld [vmem:[#allocation5 + $0x2e8] sm:$0xff]  ;;  %344 = vmatpush.msra.mxu3 %v173_v28  ;;  %304 = vmatpush.msra.mxu2 %v105_v31  ;;  %v100_v37 = vld [vmem:[#allocation5 + $0xc0] sm:$0xff]  ;;  %v123_v18 = vld [vmem:[#allocation5 + $0x178] sm:$0xff] }
  0x21   :  { %v101_v35 = vld [vmem:[#allocation5 + $0xc8] sm:$0xff]  ;;  %v168_v38 = vld [vmem:[#allocation5 + $0x2e0] sm:$0xff]  ;;  %222 = vmatpush.msra.mxu0 %v104_v33  ;;  %262 = vmatpush.msra.mxu1 %v172_v34  ;;  %v126_v19 = vld [vmem:[#allocation5 + $0x190] sm:$0xff] }
  0x22   :  { %v165_v36 = vld [vmem:[#allocation5 + $0x2c8] sm:$0xff]  ;;  %345 = vmatpush.msra.mxu3 %v169_v32  ;;  %305 = vmatpush.msra.mxu2 %v101_v35  ;;  %v96_v41 = vld [vmem:[#allocation5 + $0xa0] sm:$0xff]  ;;  %v187_v20 = vld [vmem:[#allocation5 + $0x378] sm:$0xff] }
  0x23   :  { %v97_v39 = vld [vmem:[#allocation5 + $0xa8] sm:$0xff]  ;;  %v164_v42 = vld [vmem:[#allocation5 + $0x2c0] sm:$0xff]  ;;  %223 = vmatpush.msra.mxu0 %v100_v37  ;;  %263 = vmatpush.msra.mxu1 %v168_v38  ;;  %v190_v21 = vld [vmem:[#allocation5 + $0x390] sm:$0xff] }
  0x24   :  { %v161_v40 = vld [vmem:[#allocation5 + $0x2a8] sm:$0xff]  ;;  %346 = vmatpush.msra.mxu3 %v165_v36  ;;  %306 = vmatpush.msra.mxu2 %v97_v39  ;;  %v92_v45 = vld [vmem:[#allocation5 + $0x80] sm:$0xff]  ;;  %v119_v22 = vld [vmem:[#allocation5 + $0x158] sm:$0xff] }
  0x25   :  { %v93_v43 = vld [vmem:[#allocation5 + $0x88] sm:$0xff]  ;;  %v160_v46 = vld [vmem:[#allocation5 + $0x2a0] sm:$0xff]  ;;  %224 = vmatpush.msra.mxu0 %v96_v41  ;;  %264 = vmatpush.msra.mxu1 %v164_v42  ;;  %v122_v23 = vld [vmem:[#allocation5 + $0x170] sm:$0xff] }
  0x26   :  { %v157_v44 = vld [vmem:[#allocation5 + $0x288] sm:$0xff]  ;;  %347 = vmatpush.msra.mxu3 %v161_v40  ;;  %307 = vmatpush.msra.mxu2 %v93_v43  ;;  %v88_v49 = vld [vmem:[#allocation5 + $0x60] sm:$0xff]  ;;  %v183_v24 = vld [vmem:[#allocation5 + $0x358] sm:$0xff] }
  0x27   :  { %v89_v47 = vld [vmem:[#allocation5 + $0x68] sm:$0xff]  ;;  %v156_v50 = vld [vmem:[#allocation5 + $0x280] sm:$0xff]  ;;  %225 = vmatpush.msra.mxu0 %v92_v45  ;;  %265 = vmatpush.msra.mxu1 %v160_v46  ;;  %v186_v27 = vld [vmem:[#allocation5 + $0x370] sm:$0xff] }
  0x28   :  { %v153_v48 = vld [vmem:[#allocation5 + $0x268] sm:$0xff]  ;;  %348 = vmatpush.msra.mxu3 %v157_v44  ;;  %308 = vmatpush.msra.mxu2 %v89_v47  ;;  %v84_v53 = vld [vmem:[#allocation5 + $0x40] sm:$0xff]  ;;  %v115_v28 = vld [vmem:[#allocation5 + $0x138] sm:$0xff] }
  0x29   :  { %v85_v51 = vld [vmem:[#allocation5 + $0x48] sm:$0xff]  ;;  %v152_v54 = vld [vmem:[#allocation5 + $0x260] sm:$0xff]  ;;  %226 = vmatpush.msra.mxu0 %v88_v49  ;;  %266 = vmatpush.msra.mxu1 %v156_v50  ;;  %v118_v29 = vld [vmem:[#allocation5 + $0x150] sm:$0xff] }
  0x2a   :  { %v149_v52 = vld [vmem:[#allocation5 + $0x248] sm:$0xff]  ;;  %349 = vmatpush.msra.mxu3 %v153_v48  ;;  %309 = vmatpush.msra.mxu2 %v85_v51  ;;  %v80_v57 = vld [vmem:[#allocation5 + $0x20] sm:$0xff]  ;;  %v179_v30 = vld [vmem:[#allocation5 + $0x338] sm:$0xff] }
  0x2b   :  { %v81_v55 = vld [vmem:[#allocation5 + $0x28] sm:$0xff]  ;;  %v148_v58 = vld [vmem:[#allocation5 + $0x240] sm:$0xff]  ;;  %227 = vmatpush.msra.mxu0 %v84_v53  ;;  %267 = vmatpush.msra.mxu1 %v152_v54  ;;  %v182_v31 = vld [vmem:[#allocation5 + $0x350] sm:$0xff] }
  0x2c   :  { %v145_v56 = vld [vmem:[#allocation5 + $0x228] sm:$0xff]  ;;  %350 = vmatpush.msra.mxu3 %v149_v52  ;;  %310 = vmatpush.msra.mxu2 %v81_v55  ;;  %v744_v61 = vld [vmem:[#allocation2] sm:$0xff]  ;;  %v111_v32 = vld [vmem:[#allocation5 + $0x118] sm:$0xff] }
  0x2d   :  { %v77_v59 = vld [vmem:[#allocation5 + $0x8] sm:$0xff]  ;;  %228 = vmatpush.msra.mxu0 %v80_v57  ;;  %268 = vmatpush.msra.mxu1 %v148_v58  ;;  %v76_v1 = vld [vmem:[#allocation5] sm:$0xff]  ;;  %v114_v33 = vld [vmem:[#allocation5 + $0x130] sm:$0xff] }
  0x2e   :  { %v141_v60 = vld [vmem:[#allocation5 + $0x208] sm:$0xff]  ;;  %351 = vmatpush.msra.mxu3 %v145_v56  ;;  %311 = vmatpush.msra.mxu2 %v77_v59  ;;  %v144_v2 = vld [vmem:[#allocation5 + $0x220] sm:$0xff]  ;;  %v175_v34 = vld [vmem:[#allocation5 + $0x318] sm:$0xff] }
  0x2f   :  { %v746_v62 = vld [vmem:[#allocation2 + $0x8] sm:$0xff]  ;;  %312 = vmatmul.f32.vlgmr.msra.gmra.mxu2 %v744_v61  ;;  %229 = vmatpush.msra.mxu0 %v76_v1  ;;  %v140_v6 = vld [vmem:[#allocation5 + $0x200] sm:$0xff]  ;;  %v178_v35 = vld [vmem:[#allocation5 + $0x330] sm:$0xff] }
  0x30   :  { %352 = vmatpush.msra.mxu3 %v141_v60  ;;  %460 = vmatpush.msrb.mxu2 %v139_v63  ;;  %v759_v25 = vld [vmem:[#allocation2 + $0x20] sm:$0xff]  ;;  %v761_v26 = vld [vmem:[#allocation2 + $0x28] sm:$0xff]  ;;  %v107_v36 = vld [vmem:[#allocation5 + $0xf8] sm:$0xff] }
  0x31   :  { %353 = vmatmul.f32.vlgmr.msra.gmra.mxu3 %v746_v62  ;;  %269 = vmatpush.msra.mxu1 %v144_v2  ;;  %v110_v37 = vld [vmem:[#allocation5 + $0x110] sm:$0xff]  ;;  %v171_v38 = vld [vmem:[#allocation5 + $0x2f8] sm:$0xff]  ;;  %v775_v53 = vld [vmem:[#allocation2 + $0x40] sm:$0xff] }
  0x32   :  { %501 = vmatpush.msrb.mxu3 %v203_v0  ;;  %461 = vmatpush.msrb.mxu2 %v135_v3  ;;  %v767_v39 = vld [vmem:[#allocation2 + $0x30] sm:$0xff]  ;;  %v769_v40 = vld [vmem:[#allocation2 + $0x38] sm:$0xff]  ;;  %v777_v54 = vld [vmem:[#allocation2 + $0x48] sm:$0xff] }
  0x33   :  { %230 = vmatmul.f32.vlgmr.msra.gmra.mxu0 %v744_v61  ;;  %270 = vmatpush.msra.mxu1 %v140_v6  ;;  %v174_v41 = vld [vmem:[#allocation5 + $0x310] sm:$0xff]  ;;  %v103_v42 = vld [vmem:[#allocation5 + $0xd8] sm:$0xff] }
  0x34   :  { %378 = vmatpush.msrb.mxu0 %v138_v4  ;;  %502 = vmatpush.msrb.mxu3 %v199_v5  ;;  %v106_v43 = vld [vmem:[#allocation5 + $0xf0] sm:$0xff]  ;;  %v167_v44 = vld [vmem:[#allocation5 + $0x2d8] sm:$0xff] }
  0x35   :  { %462 = vmatpush.msrb.mxu2 %v131_v7  ;;  %271 = vmatmul.f32.vlgmr.msra.gmra.mxu1 %v746_v62  ;;  %v170_v45 = vld [vmem:[#allocation5 + $0x2f0] sm:$0xff]  ;;  %v99_v46 = vld [vmem:[#allocation5 + $0xb8] sm:$0xff] }
  0x36   :  { %379 = vmatpush.msrb.mxu0 %v134_v8  ;;  %419 = vmatpush.msrb.mxu1 %v202_v9  ;;  %v102_v47 = vld [vmem:[#allocation5 + $0xd0] sm:$0xff]  ;;  %v163_v48 = vld [vmem:[#allocation5 + $0x2b8] sm:$0xff] }
  0x37   :  { %503 = vmatpush.msrb.mxu3 %v195_v10  ;;  %315 = vmatmul.f32.gmra.mxu2 %v751_v11  ;;  %v166_v49 = vld [vmem:[#allocation5 + $0x2d0] sm:$0xff]  ;;  %v95_v50 = vld [vmem:[#allocation5 + $0x98] sm:$0xff] }
  0x38   :  { %420 = vmatpush.msrb.mxu1 %v198_v13  ;;  %463 = vmatpush.msrb.mxu2 %v127_v14  ;;  %v98_v51 = vld [vmem:[#allocation5 + $0xb0] sm:$0xff]  ;;  %v159_v52 = vld [vmem:[#allocation5 + $0x298] sm:$0xff] }
  0x39   :  { %356 = vmatmul.f32.gmra.mxu3 %v753_v12  ;;  %380 = vmatpush.msrb.mxu0 %v130_v15  ;;  %v162_v55 = vld [vmem:[#allocation5 + $0x2b0] sm:$0xff]  ;;  %v91_v56 = vld [vmem:[#allocation5 + $0x78] sm:$0xff] }
  0x3a   :  { %504 = vmatpush.msrb.mxu3 %v191_v16  ;;  %421 = vmatpush.msrb.mxu1 %v194_v17  ;;  %v94_v57 = vld [vmem:[#allocation5 + $0x90] sm:$0xff]  ;;  %v155_v58 = vld [vmem:[#allocation5 + $0x278] sm:$0xff]  ;;  %v72_v16 = vld [vmem:[#allocation2 + $0x60] sm:$0xff] }
  0x3b   :  { %233 = vmatmul.f32.gmra.mxu0 %v751_v11  ;;  %464 = vmatpush.msrb.mxu2 %v123_v18  ;;  %v158_v59 = vld [vmem:[#allocation5 + $0x290] sm:$0xff]  ;;  %v87_v60 = vld [vmem:[#allocation5 + $0x58] sm:$0xff]  ;;  %v73_v17 = vld [vmem:[#allocation2 + $0x68] sm:$0xff] }
  0x3c   :  { %381 = vmatpush.msrb.mxu0 %v126_v19  ;;  %505 = vmatpush.msrb.mxu3 %v187_v20  ;;  %v90_v63 = vld [vmem:[#allocation5 + $0x70] sm:$0xff]  ;;  %v151_v0 = vld [vmem:[#allocation5 + $0x258] sm:$0xff] }
  0x3d   :  { %422 = vmatpush.msrb.mxu1 %v190_v21  ;;  %465 = vmatpush.msrb.mxu2 %v119_v22  ;;  %v154_v1 = vld [vmem:[#allocation5 + $0x270] sm:$0xff]  ;;  %v83_v2 = vld [vmem:[#allocation5 + $0x38] sm:$0xff] }
  0x3e   :  { %274 = vmatmul.f32.gmra.mxu1 %v753_v12  ;;  %382 = vmatpush.msrb.mxu0 %v122_v23  ;;  %v86_v3 = vld [vmem:[#allocation5 + $0x50] sm:$0xff]  ;;  %v147_v4 = vld [vmem:[#allocation5 + $0x238] sm:$0xff] }
  0x3f   :  { %506 = vmatpush.msrb.mxu3 %v183_v24  ;;  %318 = vmatmul.f32.gmra.mxu2 %v759_v25  ;;  %v70_v5 = vld [vmem:[#allocation2 + $0x50] sm:$0xff]  ;;  %v71_v6 = vld [vmem:[#allocation2 + $0x58] sm:$0xff] }
  0x40   :  { %423 = vmatpush.msrb.mxu1 %v186_v27  ;;  %466 = vmatpush.msrb.mxu2 %v115_v28  ;;  %v150_v7 = vld [vmem:[#allocation5 + $0x250] sm:$0xff]  ;;  %v79_v8 = vld [vmem:[#allocation5 + $0x18] sm:$0xff] }
  0x41   :  { %359 = vmatmul.f32.gmra.mxu3 %v761_v26  ;;  %383 = vmatpush.msrb.mxu0 %v118_v29  ;;  %v82_v9 = vld [vmem:[#allocation5 + $0x30] sm:$0xff]  ;;  %v143_v10 = vld [vmem:[#allocation5 + $0x218] sm:$0xff] }
  0x42   :  { %507 = vmatpush.msrb.mxu3 %v179_v30  ;;  %424 = vmatpush.msrb.mxu1 %v182_v31  ;;  %v146_v13 = vld [vmem:[#allocation5 + $0x230] sm:$0xff]  ;;  %v75_v19 = vld [vmem:[#allocation2 + $0x78] sm:$0xff] }
  0x43   :  { %236 = vmatmul.f32.gmra.mxu0 %v759_v25  ;;  %467 = vmatpush.msrb.mxu2 %v111_v32  ;;  %v78_v14 = vld [vmem:[#allocation5 + $0x10] sm:$0xff] }
  0x44   :  { %384 = vmatpush.msrb.mxu0 %v114_v33  ;;  %508 = vmatpush.msrb.mxu3 %v175_v34  ;;  %v142_v15 = vld [vmem:[#allocation5 + $0x210] sm:$0xff] }
  0x45   :  { %425 = vmatpush.msrb.mxu1 %v178_v35  ;;  %468 = vmatpush.msrb.mxu2 %v107_v36  ;;  %v74_v18 = vld [vmem:[#allocation2 + $0x70] sm:$0xff] }
  0x46   :  { %277 = vmatmul.f32.gmra.mxu1 %v761_v26  ;;  %385 = vmatpush.msrb.mxu0 %v110_v37 }
  0x47   :  { %509 = vmatpush.msrb.mxu3 %v171_v38  ;;  %321 = vmatmul.f32.gmra.mxu2 %v767_v39 }
  0x48   :  { %426 = vmatpush.msrb.mxu1 %v174_v41  ;;  %469 = vmatpush.msrb.mxu2 %v103_v42 }
  0x49   :  { %362 = vmatmul.f32.gmra.mxu3 %v769_v40  ;;  %386 = vmatpush.msrb.mxu0 %v106_v43 }
  0x4a   :  { %510 = vmatpush.msrb.mxu3 %v167_v44  ;;  %427 = vmatpush.msrb.mxu1 %v170_v45 }
  0x4b   :  { %239 = vmatmul.f32.gmra.mxu0 %v767_v39  ;;  %470 = vmatpush.msrb.mxu2 %v99_v46 }
  0x4c   :  { %387 = vmatpush.msrb.mxu0 %v102_v47  ;;  %511 = vmatpush.msrb.mxu3 %v163_v48 }
  0x4d   :  { %428 = vmatpush.msrb.mxu1 %v166_v49  ;;  %471 = vmatpush.msrb.mxu2 %v95_v50 }
  0x4e   :  { %280 = vmatmul.f32.gmra.mxu1 %v769_v40  ;;  %388 = vmatpush.msrb.mxu0 %v98_v51 }
  0x4f   :  { %512 = vmatpush.msrb.mxu3 %v159_v52  ;;  %324 = vmatmul.f32.gmra.mxu2 %v775_v53 }
  0x50   :  { %429 = vmatpush.msrb.mxu1 %v162_v55  ;;  %472 = vmatpush.msrb.mxu2 %v91_v56 }
  0x51   :  { %365 = vmatmul.f32.gmra.mxu3 %v777_v54  ;;  %389 = vmatpush.msrb.mxu0 %v94_v57 }
  0x52   :  { %513 = vmatpush.msrb.mxu3 %v155_v58  ;;  %430 = vmatpush.msrb.mxu1 %v158_v59 }
  0x53   :  { %242 = vmatmul.f32.gmra.mxu0 %v775_v53  ;;  %473 = vmatpush.msrb.mxu2 %v87_v60 }
  0x54   :  { %390 = vmatpush.msrb.mxu0 %v90_v63  ;;  %514 = vmatpush.msrb.mxu3 %v151_v0 }
  0x55   :  { %431 = vmatpush.msrb.mxu1 %v154_v1  ;;  %474 = vmatpush.msrb.mxu2 %v83_v2 }
  0x56   :  { %283 = vmatmul.f32.gmra.mxu1 %v777_v54  ;;  %391 = vmatpush.msrb.mxu0 %v86_v3 }
  0x57   :  { %515 = vmatpush.msrb.mxu3 %v147_v4  ;;  %327 = vmatmul.f32.gmra.mxu2 %v70_v5 }
  0x58   :  { %432 = vmatpush.msrb.mxu1 %v150_v7  ;;  %475 = vmatpush.msrb.mxu2 %v79_v8 }
  0x59   :  { %368 = vmatmul.f32.gmra.mxu3 %v71_v6  ;;  %392 = vmatpush.msrb.mxu0 %v82_v9 }
  0x5a   :  { %516 = vmatpush.msrb.mxu3 %v143_v10  ;;  %433 = vmatpush.msrb.mxu1 %v146_v13 }
  0x5b   :  { %245 = vmatmul.f32.gmra.mxu0 %v70_v5 }
  0x5c   :  { %393 = vmatpush.msrb.mxu0 %v78_v14  ;;  %434 = vmatpush.msrb.mxu1 %v142_v15 }
  0x5e   :  { %286 = vmatmul.f32.gmra.mxu1 %v71_v6 }
  0x5f   :  { %330 = vmatmul.f32.gmra.mxu2 %v72_v16 }
  0x61   :  { %371 = vmatmul.f32.gmra.mxu3 %v73_v17 }
  0x63   :  { %248 = vmatmul.f32.gmra.mxu0 %v72_v16 }
  0x66   :  { %289 = vmatmul.f32.gmra.mxu1 %v73_v17 }
  0x67   :  { %333 = vmatmul.f32.gmra.mxu2 %v74_v18 }
  0x69   :  { %374 = vmatmul.f32.gmra.mxu3 %v75_v19 }
  0x6b   :  { %251 = vmatmul.f32.gmra.mxu0 %v74_v18 }
  0x6e   :  { %292 = vmatmul.f32.gmra.mxu1 %v75_v19 }
  0x6f   :  { %476 = vmatmul.f32.vlgmr.msrb.gmra.mxu2 %v744_v61 }
  0x71   :  { %517 = vmatmul.f32.vlgmr.msrb.gmra.mxu3 %v746_v62 }
  0x73   :  { %394 = vmatmul.f32.vlgmr.msrb.gmra.mxu0 %v744_v61  ;;  %v804_v61 = vld [vmem:[#allocation7] sm:$0xf] }
  0x76   :  { %435 = vmatmul.f32.vlgmr.msrb.gmra.mxu1 %v746_v62  ;;  %v807_v62 = vperm.slane %v804_v61, 0 }
  0x77   :  { %479 = vmatmul.f32.gmra.mxu2 %v751_v11 }
  0x79   :  { %520 = vmatmul.f32.gmra.mxu3 %v753_v12 }
  0x7b   :  { %397 = vmatmul.f32.gmra.mxu0 %v751_v11 }
  0x7e   :  { %438 = vmatmul.f32.gmra.mxu1 %v753_v12  ;;  %v810_v12 = vperm.slane %v804_v61, 1 }
  0x7f   :  { %482 = vmatmul.f32.gmra.mxu2 %v759_v25 }
  0x81   :  { %523 = vmatmul.f32.gmra.mxu3 %v761_v26 }
  0x83   :  { %400 = vmatmul.f32.gmra.mxu0 %v759_v25 }
  0x86   :  { %441 = vmatmul.f32.gmra.mxu1 %v761_v26 }
  0x87   :  { %485 = vmatmul.f32.gmra.mxu2 %v767_v39 }
  0x89   :  { %526 = vmatmul.f32.gmra.mxu3 %v769_v40 }
  0x8b   :  { %403 = vmatmul.f32.gmra.mxu0 %v767_v39 }
  0x8e   :  { %444 = vmatmul.f32.gmra.mxu1 %v769_v40 }
  0x8f   :  { %488 = vmatmul.f32.gmra.mxu2 %v775_v53 }
  0x91   :  { %529 = vmatmul.f32.gmra.mxu3 %v777_v54 }
  0x93   :  { %406 = vmatmul.f32.gmra.mxu0 %v775_v53 }
  0x96   :  { %447 = vmatmul.f32.gmra.mxu1 %v777_v54 }
  0x97   :  { %491 = vmatmul.f32.gmra.mxu2 %v70_v5 }
  0x99   :  { %532 = vmatmul.f32.gmra.mxu3 %v71_v6 }
  0x9b   :  { %409 = vmatmul.f32.gmra.mxu0 %v70_v5 }
  0x9e   :  { %450 = vmatmul.f32.gmra.mxu1 %v71_v6 }
  0x9f   :  { %494 = vmatmul.f32.gmra.mxu2 %v72_v16 }
  0xa1   :  { %535 = vmatmul.f32.gmra.mxu3 %v73_v17 }
  0xa3   :  { %412 = vmatmul.f32.gmra.mxu0 %v72_v16 }
  0xa6   :  { %453 = vmatmul.f32.gmra.mxu1 %v73_v17 }
  0xa7   :  { %497 = vmatmul.f32.gmra.mxu2 %v74_v18 }
  0xa9   :  { %538 = vmatmul.f32.gmra.mxu3 %v75_v19 }
  0xab   :  { %415 = vmatmul.f32.gmra.mxu0 %v74_v18 }
  0xae   :  { %456 = vmatmul.f32.gmra.mxu1 %v75_v19 }
  0xb0   :  { %v231_v11 = vpop.f32.mrf.mxu0 }
  0xb1   :  { %v232_v20 = vadd.f32 %v231_v11, %v807_v62 }
  0xb2   :  { %v313_v21 = vpop.f32.mrf.mxu2  ;;  %v272_v22 = vpop.f32.mrf.mxu1 }
  0xb3   :  { %v314_v23 = vadd.f32 %v313_v21, %v810_v12  ;;  %v273_v24 = vadd.f32 %v272_v22, %v232_v20  ;;  %v829_v21 = vperm.slane %v804_v61, 2 }
  0xb4   :  { %v354_v25 = vpop.f32.mrf.mxu3 }
  0xb5   :  { %542 = vst [vmem:[#allocation8] sm:$0xff] %v273_v24  ;;  %v355_v26 = vadd.f32 %v354_v25, %v314_v23  ;;  %v832_v24 = vperm.slane %v804_v61, 3 }
  0xb7   :  { %543 = vst [vmem:[#allocation8 + $0x8] sm:$0xff] %v355_v26 }
  0xb8   :  { %v234_v27 = vpop.f32.mrf.mxu0 }
  0xb9   :  { %v235_v28 = vadd.f32 %v234_v27, %v807_v62 }
  0xba   :  { %v316_v29 = vpop.f32.mrf.mxu2 }
  0xbb   :  { %v275_v30 = vpop.f32.mrf.mxu1  ;;  %v317_v31 = vadd.f32 %v316_v29, %v810_v12 }
  0xbc   :  { %v276_v32 = vadd.f32 %v275_v30, %v235_v28  ;;  %v357_v33 = vpop.f32.mrf.mxu3 }
  0xbd   :  { %v358_v34 = vadd.f32 %v357_v33, %v317_v31 }
  0xbe   :  { %546 = vst [vmem:[#allocation8 + $0x20] sm:$0xff] %v276_v32 }
  0xbf   :  { %547 = vst [vmem:[#allocation8 + $0x28] sm:$0xff] %v358_v34 }
  0xc0   :  { %v237_v35 = vpop.f32.mrf.mxu0 }
  0xc1   :  { %v238_v36 = vadd.f32 %v237_v35, %v807_v62 }
  0xc2   :  { %v319_v37 = vpop.f32.mrf.mxu2 }
  0xc3   :  { %v278_v38 = vpop.f32.mrf.mxu1  ;;  %v320_v39 = vadd.f32 %v319_v37, %v810_v12 }
  0xc4   :  { %v279_v40 = vadd.f32 %v278_v38, %v238_v36  ;;  %v360_v41 = vpop.f32.mrf.mxu3 }
  0xc5   :  { %v361_v42 = vadd.f32 %v360_v41, %v320_v39 }
  0xc6   :  { %550 = vst [vmem:[#allocation8 + $0x40] sm:$0xff] %v279_v40 }
  0xc7   :  { %551 = vst [vmem:[#allocation8 + $0x48] sm:$0xff] %v361_v42 }
  0xc8   :  { %v240_v43 = vpop.f32.mrf.mxu0 }
  0xc9   :  { %v241_v44 = vadd.f32 %v240_v43, %v807_v62 }
  0xca   :  { %v322_v45 = vpop.f32.mrf.mxu2 }
  0xcb   :  { %v281_v46 = vpop.f32.mrf.mxu1  ;;  %v323_v47 = vadd.f32 %v322_v45, %v810_v12 }
  0xcc   :  { %v282_v48 = vadd.f32 %v281_v46, %v241_v44  ;;  %v363_v49 = vpop.f32.mrf.mxu3 }
  0xcd   :  { %v364_v50 = vadd.f32 %v363_v49, %v323_v47 }
  0xce   :  { %554 = vst [vmem:[#allocation8 + $0x60] sm:$0xff] %v282_v48 }
  0xcf   :  { %555 = vst [vmem:[#allocation8 + $0x68] sm:$0xff] %v364_v50 }
  0xd0   :  { %v243_v51 = vpop.f32.mrf.mxu0 }
  0xd1   :  { %v244_v52 = vadd.f32 %v243_v51, %v807_v62 }
  0xd2   :  { %v325_v53 = vpop.f32.mrf.mxu2 }
  0xd3   :  { %v284_v54 = vpop.f32.mrf.mxu1  ;;  %v326_v55 = vadd.f32 %v325_v53, %v810_v12 }
  0xd4   :  { %v285_v56 = vadd.f32 %v284_v54, %v244_v52  ;;  %v366_v57 = vpop.f32.mrf.mxu3 }
  0xd5   :  { %v367_v58 = vadd.f32 %v366_v57, %v326_v55 }
  0xd6   :  { %558 = vst [vmem:[#allocation8 + $0x80] sm:$0xff] %v285_v56 }
  0xd7   :  { %559 = vst [vmem:[#allocation8 + $0x88] sm:$0xff] %v367_v58 }
  0xd8   :  { %v246_v59 = vpop.f32.mrf.mxu0 }
  0xd9   :  { %v247_v60 = vadd.f32 %v246_v59, %v807_v62 }
  0xda   :  { %v328_v63 = vpop.f32.mrf.mxu2 }
  0xdb   :  { %v287_v0 = vpop.f32.mrf.mxu1  ;;  %v329_v1 = vadd.f32 %v328_v63, %v810_v12 }
  0xdc   :  { %v288_v2 = vadd.f32 %v287_v0, %v247_v60  ;;  %v369_v3 = vpop.f32.mrf.mxu3 }
  0xdd   :  { %v370_v4 = vadd.f32 %v369_v3, %v329_v1 }
  0xde   :  { %562 = vst [vmem:[#allocation8 + $0xa0] sm:$0xff] %v288_v2 }
  0xdf   :  { %563 = vst [vmem:[#allocation8 + $0xa8] sm:$0xff] %v370_v4 }
  0xe0   :  { %v249_v5 = vpop.f32.mrf.mxu0 }
  0xe1   :  { %v250_v6 = vadd.f32 %v249_v5, %v807_v62 }
  0xe2   :  { %v331_v7 = vpop.f32.mrf.mxu2 }
  0xe3   :  { %v290_v8 = vpop.f32.mrf.mxu1  ;;  %v332_v9 = vadd.f32 %v331_v7, %v810_v12 }
  0xe4   :  { %v291_v10 = vadd.f32 %v290_v8, %v250_v6  ;;  %v372_v13 = vpop.f32.mrf.mxu3 }
  0xe5   :  { %v373_v14 = vadd.f32 %v372_v13, %v332_v9 }
  0xe6   :  { %566 = vst [vmem:[#allocation8 + $0xc0] sm:$0xff] %v291_v10 }
  0xe7   :  { %567 = vst [vmem:[#allocation8 + $0xc8] sm:$0xff] %v373_v14 }
  0xe8   :  { %v252_v15 = vpop.f32.mrf.mxu0 }
  0xe9   :  { %v253_v16 = vadd.f32 %v252_v15, %v807_v62 }
  0xea   :  { %v334_v17 = vpop.f32.mrf.mxu2 }
  0xeb   :  { %v293_v18 = vpop.f32.mrf.mxu1  ;;  %v335_v19 = vadd.f32 %v334_v17, %v810_v12 }
  0xec   :  { %v294_v11 = vadd.f32 %v293_v18, %v253_v16  ;;  %v375_v20 = vpop.f32.mrf.mxu3 }
  0xed   :  { %v376_v22 = vadd.f32 %v375_v20, %v335_v19 }
  0xee   :  { %570 = vst [vmem:[#allocation8 + $0xe0] sm:$0xff] %v294_v11 }
  0xef   :  { %571 = vst [vmem:[#allocation8 + $0xe8] sm:$0xff] %v376_v22 }
  0xf0   :  { %v395_v23 = vpop.f32.mrf.mxu0 }
  0xf1   :  { %v396_v25 = vadd.f32 %v395_v23, %v829_v21 }
  0xf2   :  { %v477_v26 = vpop.f32.mrf.mxu2 }
  0xf3   :  { %v436_v62 = vpop.f32.mrf.mxu1  ;;  %v478_v27 = vadd.f32 %v477_v26, %v832_v24 }
  0xf4   :  { %v437_v28 = vadd.f32 %v436_v62, %v396_v25  ;;  %v518_v12 = vpop.f32.mrf.mxu3 }
  0xf5   :  { %v519_v29 = vadd.f32 %v518_v12, %v478_v27 }
  0xf6   :  { %544 = vst [vmem:[#allocation8 + $0x10] sm:$0xff] %v437_v28 }
  0xf7   :  { %545 = vst [vmem:[#allocation8 + $0x18] sm:$0xff] %v519_v29 }
  0xf8   :  { %v398_v30 = vpop.f32.mrf.mxu0 }
  0xf9   :  { %v399_v31 = vadd.f32 %v398_v30, %v829_v21 }
  0xfa   :  { %v480_v32 = vpop.f32.mrf.mxu2 }
  0xfb   :  { %v439_v33 = vpop.f32.mrf.mxu1  ;;  %v481_v34 = vadd.f32 %v480_v32, %v832_v24 }
  0xfc   :  { %v440_v61 = vadd.f32 %v439_v33, %v399_v31  ;;  %v521_v35 = vpop.f32.mrf.mxu3 }
  0xfd   :  { %v522_v36 = vadd.f32 %v521_v35, %v481_v34 }
  0xfe   :  { %548 = vst [vmem:[#allocation8 + $0x30] sm:$0xff] %v440_v61 }
  0xff   :  { %549 = vst [vmem:[#allocation8 + $0x38] sm:$0xff] %v522_v36 }
 0x100   :  { %v401_v37 = vpop.f32.mrf.mxu0 }
 0x101   :  { %v402_v38 = vadd.f32 %v401_v37, %v829_v21 }
 0x102   :  { %v483_v39 = vpop.f32.mrf.mxu2 }
 0x103   :  { %v442_v40 = vpop.f32.mrf.mxu1  ;;  %v484_v41 = vadd.f32 %v483_v39, %v832_v24 }
 0x104   :  { %v443_v42 = vadd.f32 %v442_v40, %v402_v38  ;;  %v524_v43 = vpop.f32.mrf.mxu3 }
 0x105   :  { %v525_v44 = vadd.f32 %v524_v43, %v484_v41 }
 0x106   :  { %552 = vst [vmem:[#allocation8 + $0x50] sm:$0xff] %v443_v42 }
 0x107   :  { %553 = vst [vmem:[#allocation8 + $0x58] sm:$0xff] %v525_v44 }
 0x108   :  { %v404_v45 = vpop.f32.mrf.mxu0 }
 0x109   :  { %v405_v46 = vadd.f32 %v404_v45, %v829_v21 }
 0x10a   :  { %v486_v47 = vpop.f32.mrf.mxu2 }
 0x10b   :  { %v445_v48 = vpop.f32.mrf.mxu1  ;;  %v487_v49 = vadd.f32 %v486_v47, %v832_v24 }
 0x10c   :  { %v446_v50 = vadd.f32 %v445_v48, %v405_v46  ;;  %v527_v51 = vpop.f32.mrf.mxu3 }
 0x10d   :  { %v528_v52 = vadd.f32 %v527_v51, %v487_v49 }
 0x10e   :  { %556 = vst [vmem:[#allocation8 + $0x70] sm:$0xff] %v446_v50 }
 0x10f   :  { %557 = vst [vmem:[#allocation8 + $0x78] sm:$0xff] %v528_v52 }
 0x110   :  { %v407_v53 = vpop.f32.mrf.mxu0 }
 0x111   :  { %v408_v54 = vadd.f32 %v407_v53, %v829_v21 }
 0x112   :  { %v489_v55 = vpop.f32.mrf.mxu2 }
 0x113   :  { %v448_v56 = vpop.f32.mrf.mxu1  ;;  %v490_v57 = vadd.f32 %v489_v55, %v832_v24 }
 0x114   :  { %v449_v58 = vadd.f32 %v448_v56, %v408_v54  ;;  %v530_v59 = vpop.f32.mrf.mxu3 }
 0x115   :  { %v531_v60 = vadd.f32 %v530_v59, %v490_v57 }
 0x116   :  { %560 = vst [vmem:[#allocation8 + $0x90] sm:$0xff] %v449_v58 }
 0x117   :  { %561 = vst [vmem:[#allocation8 + $0x98] sm:$0xff] %v531_v60 }
 0x118   :  { %v410_v63 = vpop.f32.mrf.mxu0 }
 0x119   :  { %v411_v0 = vadd.f32 %v410_v63, %v829_v21 }
 0x11a   :  { %v492_v1 = vpop.f32.mrf.mxu2 }
 0x11b   :  { %v451_v2 = vpop.f32.mrf.mxu1  ;;  %v493_v3 = vadd.f32 %v492_v1, %v832_v24 }
 0x11c   :  { %v452_v4 = vadd.f32 %v451_v2, %v411_v0  ;;  %v533_v5 = vpop.f32.mrf.mxu3 }
 0x11d   :  { %v534_v6 = vadd.f32 %v533_v5, %v493_v3 }
 0x11e   :  { %564 = vst [vmem:[#allocation8 + $0xb0] sm:$0xff] %v452_v4 }
 0x11f   :  { %565 = vst [vmem:[#allocation8 + $0xb8] sm:$0xff] %v534_v6 }
 0x120   :  { %v413_v7 = vpop.f32.mrf.mxu0 }
 0x121   :  { %v414_v8 = vadd.f32 %v413_v7, %v829_v21 }
 0x122   :  { %v495_v9 = vpop.f32.mrf.mxu2 }
 0x123   :  { %v454_v10 = vpop.f32.mrf.mxu1  ;;  %v496_v13 = vadd.f32 %v495_v9, %v832_v24 }
 0x124   :  { %v455_v14 = vadd.f32 %v454_v10, %v414_v8  ;;  %v536_v15 = vpop.f32.mrf.mxu3 }
 0x125   :  { %v537_v16 = vadd.f32 %v536_v15, %v496_v13 }
 0x126   :  { %568 = vst [vmem:[#allocation8 + $0xd0] sm:$0xff] %v455_v14 }
 0x127   :  { %569 = vst [vmem:[#allocation8 + $0xd8] sm:$0xff] %v537_v16 }
 0x128   :  { %v416_v17 = vpop.f32.mrf.mxu0 }
 0x129   :  { %v417_v18 = vadd.f32 %v416_v17, %v829_v21 }
 0x12a   :  { %v498_v19 = vpop.f32.mrf.mxu2 }
 0x12b   :  { %v457_v11 = vpop.f32.mrf.mxu1  ;;  %v499_v20 = vadd.f32 %v498_v19, %v832_v24 }
 0x12c   :  { %v458_v22 = vadd.f32 %v457_v11, %v417_v18  ;;  %v539_v23 = vpop.f32.mrf.mxu3 }
 0x12d   :  { %v540_v25 = vadd.f32 %v539_v23, %v499_v20 }
 0x12e   :  { %572 = vst [vmem:[#allocation8 + $0xf0] sm:$0xff] %v458_v22 }
 0x12f   :  { %573 = vst [vmem:[#allocation8 + $0xf8] sm:$0xff] %v540_v25 }
 0x130   :  { %586 = dma.vmem_to_hbm [thread:$0]  %s579_s29, 4096, %s581_s5, [#allocation4], %s705_s20, %s705_s20, %s706_s21  }
 0x131   :  { %702 = dma.done.wait [#allocation4], 4096  }
 0x132   :  { %703 = vsyncadd [#allocation4], 4294963200 }
 0x133   :  { %591 = vsyncpa [#allocation3], 1 }
 0x134   :  { %592 = vsyncpa [#allocation6], 1 }
 0x135   :  { %593 = vsyncpa [#allocation4], 1 }

</bundles_post_ra>
